<compile_context>
chip_gen: v5e
topology: v5e:2x2
jax: 0.10.0
libtpu: 0.0.40
codegen_flags: <defaults>
</compile_context>

<pallas_src>
import jax
import jax.numpy as jnp
from jax.experimental import pallas as pl
from jax.experimental.pallas import tpu as pltpu


def _make_sigmoid_kernel(out_dtype):
    # Exact f32 divide for >=32-bit outputs (meets tight tolerances); for
    # narrow dtypes the EUP approx reciprocal is free (own bundle slot) and
    # well below the output precision.
    exact_div = jnp.dtype(out_dtype).itemsize >= 4

    def kernel(x_ref, o_ref):
        x = x_ref[...].astype(jnp.float32)      # exp on the EUP, adds on the VPU
        denom = 1.0 + jnp.exp(-x)
        if exact_div:
            y = 1.0 / denom
        else:
            y = pl.reciprocal(denom, approx=True)
        o_ref[...] = y.astype(o_ref.dtype)

    return kernel


def _sublane_multiple(dtype) -> int:
    # (8,128) tiling granularity scales with packing: f32->8, bf16->16, int8->32.
    itemsize = jnp.dtype(dtype).itemsize
    return max(8, 32 // max(1, itemsize))


def _pick_2d_layout(n_elems: int):
    """Lane-dense (R, C): C a multiple of 128, as wide as practical (<=2048)."""
    assert n_elems % 128 == 0, "caller must pad to a multiple of 128"
    c = 128
    for cand in range(2048, 127, -128):
        if n_elems % cand == 0:
            c = cand
            break
    return n_elems // c, c


def _device_params():
    """Generation-aware tile / VMEM budget and megacore sharding choice."""
    kind = ""
    try:
        kind = jax.devices()[0].device_kind.lower()
    except Exception:
        pass
    if "v7" in kind:
        # 64 MiB physical VMEM per TensorCore, 2 TCs per chip.
        return {"target_tile_bytes": 8 << 20, "vmem_limit_bytes": 48 << 20,
                "core_parallel": True}
    if any(("v%d" % g) in kind for g in (2, 3, 4, 5, 6)):
        # 128 MiB physical VMEM, single TensorCore per chip.
        return {"target_tile_bytes": 8 << 20, "vmem_limit_bytes": 96 << 20,
                "core_parallel": False}
    # Unknown device: budget that is safe on every generation.
    return {"target_tile_bytes": 4 << 20, "vmem_limit_bytes": 48 << 20,
            "core_parallel": False}


def _choose_rows_per_block(R, C, itemsize, sub, target_tile_bytes, min_steps):
    """Rows per tile: ~target_tile_bytes, sublane-aligned, >= ~1 MiB, and enough
    grid steps for double-buffered pipelining (and both cores on v7x)."""
    bytes_per_row = max(1, C * itemsize)
    tr = max(sub, (target_tile_bytes // bytes_per_row) // sub * sub)
    tr = min(tr, R)
    floor_rows = max(sub, ((1 << 20) // bytes_per_row) // sub * sub)
    if pl.cdiv(R, tr) < min_steps:
        want = max(sub, (R // min_steps) // sub * sub)
        tr = min(tr, max(want, floor_rows))
    # Invariant: tr is either == R (full dim) or a multiple of `sub` -> legal.
    return max(1, min(tr, R))


def sigmoid_afxn(x, *, target_tile_bytes=None):
    """Pallas TPU implementation of Sigmoid_afxn.forward: y = 1/(1+exp(-x)).

    Accepts any-rank input; the wrapper flattens to a lane-dense 2D layout
    (pure glue: reshape + optional zero padding) and restores the shape.
    """
    orig_shape = x.shape
    n = x.size
    if n == 0:
        return x

    itemsize = jnp.dtype(x.dtype).itemsize
    sub = _sublane_multiple(x.dtype)
    params = _device_params()
    if target_tile_bytes is None:
        target_tile_bytes = params["target_tile_bytes"]

    # Pad odd sizes to a full (sub x 128) quantum so the normal tiled,
    # pipelined path always applies; sigmoid of the zero padding is discarded.
    x_flat = x.reshape(-1)
    quantum = sub * 128
    if n % 128 != 0:
        n_pad = ((n + quantum - 1) // quantum) * quantum
        x_flat = jnp.pad(x_flat, (0, n_pad - n))
    else:
        n_pad = n

    R, C = _pick_2d_layout(n_pad)
    x2d = x_flat.reshape(R, C)

    min_steps = 8 if params["core_parallel"] else 4
    tr = _choose_rows_per_block(R, C, itemsize, sub, target_tile_bytes, min_steps)
    grid = (pl.cdiv(R, tr),)

    kernel = _make_sigmoid_kernel(x.dtype)
    cost = pl.CostEstimate(flops=2 * n_pad, transcendentals=n_pad,
                           bytes_accessed=2 * n_pad * itemsize)

    def run(dim_sem):
        return pl.pallas_call(
            kernel,
            out_shape=jax.ShapeDtypeStruct((R, C), x.dtype),
            grid_spec=pltpu.PrefetchScalarGridSpec(
                num_scalar_prefetch=0,
                grid=grid,
                in_specs=[pl.BlockSpec((tr, C), lambda i: (i, 0))],
                out_specs=pl.BlockSpec((tr, C), lambda i: (i, 0)),
            ),
            compiler_params=pltpu.CompilerParams(
                dimension_semantics=(dim_sem,),
                vmem_limit_bytes=params["vmem_limit_bytes"],
            ),
            cost_estimate=cost,
        )(x2d)

    core_parallel_sem = getattr(pltpu, "CORE_PARALLEL", None)
    if params["core_parallel"] and core_parallel_sem is not None:
        # Shard the row loop across both v7x TensorCores (each has its own HBM
        # path); fall back to the portable semantics if rejected.
        try:
            out2d = run(core_parallel_sem)
        except Exception:
            out2d = run("parallel")
    else:
        out2d = run("parallel")

    out_flat = out2d.reshape(-1)
    if n_pad != n:
        out_flat = out_flat[:n]
    return out_flat.reshape(orig_shape)


if __name__ == "__main__":
    key = jax.random.PRNGKey(0)
    # Module has no parameters; forward is y = sigmoid(x).
    x4d = jax.random.normal(key, (2, 4, 16, 16), dtype=jnp.float32)

    y = sigmoid_afxn(x4d)
    jax.block_until_ready(y)

    ref = 1.0 / (1.0 + jnp.exp(-x4d))
    assert y.shape == x4d.shape and y.dtype == x4d.dtype
    assert jnp.allclose(y, ref, atol=1e-5, rtol=1e-5), "mismatch vs sigmoid reference"

    # Exercise the padded path (size not divisible by 128).
    x_odd = jax.random.normal(jax.random.PRNGKey(1), (3, 7, 5), dtype=jnp.float32)
    y_odd = sigmoid_afxn(x_odd)
    jax.block_until_ready(y_odd)
    ref_odd = 1.0 / (1.0 + jnp.exp(-x_odd))
    assert y_odd.shape == x_odd.shape and y_odd.dtype == x_odd.dtype
    assert jnp.allclose(y_odd, ref_odd, atol=1e-5, rtol=1e-5), "mismatch on padded path"

    print("KERNEL_OK")
</pallas_src>

<mosaic_0001>
module attributes {stable_mosaic.version = 11 : i64} {
  func.func @kernel(%arg0: i32, %arg1: memref<1x2048xf32, #tpu.memory_space<vmem>>, %arg2: memref<1x2048xf32, #tpu.memory_space<vmem>>) attributes {dimension_semantics = [#tpu.dimension_semantics<parallel>], iteration_bounds = array<i64: 1>, scalar_prefetch = 0 : i64, scratch_operands = 0 : i64, tpu.core_type = #tpu.core_type<tc>, window_params = [{transform_indices = @transform_0, window_bounds = array<i64: 1, 2048>}, {transform_indices = @transform_1, window_bounds = array<i64: 1, 2048>}]} {
    %c0 = arith.constant 0 : index
    %c0_0 = arith.constant 0 : index
    %0 = vector.load %arg1[%c0, %c0_0] : memref<1x2048xf32, #tpu.memory_space<vmem>>, vector<1x2048xf32>
    %cst = arith.constant 0.000000e+00 : f32
    %1 = vector.broadcast %cst : f32 to vector<1x2048xf32>
    %2 = arith.subf %1, %0 : vector<1x2048xf32>
    %3 = math.exp %2 : vector<1x2048xf32>
    %cst_1 = arith.constant 1.000000e+00 : f32
    %4 = vector.broadcast %cst_1 : f32 to vector<1x2048xf32>
    %5 = arith.addf %4, %3 : vector<1x2048xf32>
    %cst_2 = arith.constant 1.000000e+00 : f32
    %6 = vector.broadcast %cst_2 : f32 to vector<1x2048xf32>
    %7 = arith.divf %6, %5 : vector<1x2048xf32>
    %c0_3 = arith.constant 0 : index
    %c0_4 = arith.constant 0 : index
    %8 = vector.load %arg2[%c0_3, %c0_4] : memref<1x2048xf32, #tpu.memory_space<vmem>>, vector<1x2048xf32>
    tpu.vector_store %arg2[%c0_3, %c0_4], %7 {strides = array<i32>} : memref<1x2048xf32, #tpu.memory_space<vmem>>, vector<1x2048xf32>,
    return
  }
  func.func @transform_0(%arg0: i32) -> (i32, i32) {
    %c0_i32 = arith.constant 0 : i32
    %c0_i32_0 = arith.constant 0 : i32
    return %arg0, %c0_i32 : i32, i32
  }
  func.func @transform_1(%arg0: i32) -> (i32, i32) {
    %c0_i32 = arith.constant 0 : i32
    %c0_i32_0 = arith.constant 0 : i32
    return %arg0, %c0_i32 : i32, i32
  }
}

</mosaic_0001>

<bundles_post_ra>
// kernel: tpu_custom_call.1
= control target key start
LH: loop header
LB: loop body
LE: loop exit
PB: predicated region body
PF: predicated region fallthrough
CT: control target
= control target key end

     0   :  { %6 = vsyncpa [#allocation3], 0  ;;  %s162_s0 = inlined_call_operand.hbm [shape: f32[1,2048], index: 0, kind: input, shape index: {}]   ;;  %s163_s1 = inlined_call_operand.hbm [shape: f32[1,2048], index: 1, kind: output, shape index: {}]  }
   0x1   :  { %7 = vsyncpa [#allocation4], 0  ;;  %s13_s8 = sshll.u32 %s162_s0, 4  ;;  %s144_s9 = smov [#allocation2]   ;;  %s14_s8 = int_to_ptr.hbm [resolvable:$true] %s13_s8 }
   0x2   :  { %s15_s10 = sshll.u32 %s144_s9, 4  ;;  %s16_s10 = int_to_ptr.vmem [resolvable:$true] %s15_s10 }
   0x3   :  { %18 = dma.hbm_to_vmem [thread:$0]  %s14_s8, 256, %s16_s10, [#allocation3]  }
   0x4   :  { %140 = dma.done.wait [#allocation3], 256  }
   0x5   :  { %141 = vsyncadd [#allocation3], 4294967040  ;;  %v23_v0 = vld [vmem:[#allocation2] sm:$0xff]  ;;  %v24_v1 = vld [vmem:[#allocation2 + $0x8] sm:$0xff]  ;;  %s145_s0 = smov [#allocation5]   ;;  %s72_s14 = sshll.u32 %s163_s1, 4  ;;  %s73_s14 = int_to_ptr.hbm [resolvable:$true] %s72_s14 }
   0x6   :  { %v25_v2 = vsub.f32 0.0, %v23_v0  ;;  %v26_v3 = vsub.f32 0.0, %v24_v1  ;;  %s70_s11 = sshll.u32 %s145_s0, 4  ;;  %s71_s11 = int_to_ptr.vmem [resolvable:$true] %s70_s11 }
   0x8   :  { %v27_v4 = vmul.f32 1.442695, %v25_v2  ;;  %v29_v5 = vmul.f32 1.442695, %v26_v3 }
   0xa   :  { %84 = vpow2.f32 %v27_v4 }
   0xb   :  { %86 = vpow2.f32 %v29_v5 }
  0x10   :  { %v85_v6 = vpop.eup %84 }
  0x11   :  { %v87_v7 = vpop.eup %86  ;;  %v31_v8 = vadd.f32 1.0, %v85_v6 }
  0x12   :  { %v32_v9 = vadd.f32 1.0, %v87_v7 }
  0x13   :  { %88 = vrcp.f32 %v31_v8  ;;  %vm38_vm0 = vweird.f32 %v31_v8  ;;  %v44_v13 = vand.u32 2147483648, %v31_v8  ;;  %v42_v16 = vand.u32 2147483647, %v31_v8 }
  0x14   :  { %90 = vrcp.f32 %v32_v9  ;;  %v59_v17 = vand.u32 2147483648, %v32_v9  ;;  %vm53_vm2 = vweird.f32 %v32_v9  ;;  %v57_v19 = vand.u32 2147483647, %v32_v9 }
  0x15   :  { %v45_v21 = vor.u32 1.1754944e-38, %v44_v13  ;;  %vm43_vm5 = vcmp.eq.f32.partialorder %v42_v16, 8.507059e+37 }
  0x16   :  { %v60_v24 = vor.u32 1.1754944e-38, %v59_v17  ;;  %vm58_vm7 = vcmp.eq.f32.partialorder %v57_v19, 8.507059e+37 }
  0x19   :  { %v89_v10 = vpop.eup %88 }
  0x1a   :  { %v91_v11 = vpop.eup %90  ;;  %v34_v12 = vmul.f32 %v89_v10, %v31_v8  ;;  %vm39_vm1 = vweird.f32 %v89_v10 }
  0x1b   :  { %v49_v14 = vmul.f32 %v91_v11, %v32_v9  ;;  %vm54_vm3 = vweird.f32 %v91_v11  ;;  %vm40_vm4 = vmor %vm38_vm0, %vm39_vm1 }
  0x1c   :  { %v35_v15 = vsub.f32 1.0, %v34_v12  ;;  %vm55_vm6 = vmor %vm53_vm2, %vm54_vm3 }
  0x1d   :  { %v50_v18 = vsub.f32 1.0, %v49_v14 }
  0x1e   :  { %v36_v20 = vmul.f32 %v89_v10, %v35_v15 }
  0x1f   :  { %v51_v22 = vmul.f32 %v91_v11, %v50_v18 }
  0x20   :  { %v37_v23 = vadd.f32 %v89_v10, %v36_v20 }
  0x21   :  { %v52_v25 = vadd.f32 %v91_v11, %v51_v22 }
  0x22   :  { %v41_v26 = vsel %vm40_vm4, %v89_v10, %v37_v23 }
  0x23   :  { %v46_v27 = vsel %vm43_vm5, %v45_v21, %v41_v26  ;;  %v56_v28 = vsel %vm55_vm6, %v91_v11, %v52_v25 }
  0x24   :  { %63 = vst [vmem:[#allocation5] sm:$0xff] %v46_v27  ;;  %v61_v29 = vsel %vm58_vm7, %v60_v24, %v56_v28 }
  0x25   :  { %64 = vst [vmem:[#allocation5 + $0x8] sm:$0xff] %v61_v29 }
  0x26   :  { %75 = dma.vmem_to_hbm [thread:$0]  %s71_s11, 256, %s73_s14, [#allocation4]  }
  0x27   :  { %142 = dma.done.wait [#allocation4], 256  }
  0x28   :  { %143 = vsyncadd [#allocation4], 4294967040 }
  0x29   :  { %80 = vsyncpa [#allocation3], 1 }
  0x2a   :  { %81 = vsyncpa [#allocation4], 1 }

</bundles_post_ra>
